<compile_context>
chip_gen: v7x
topology: tpu7x:2x2x1
jax: 0.10.0
libtpu: 0.0.40
codegen_flags: <defaults>
</compile_context>

<pallas_src>
import jax
import jax.numpy as jnp
from jax.experimental import pallas as pl
from jax.experimental.pallas import tpu as pltpu

# --- model hyperparameters (synthetic, small) --------------------------------
IMAGE_SIZE = 16
CHANNELS = 4
LATENT_DIM = 16

D_IN = IMAGE_SIZE * IMAGE_SIZE * CHANNELS   # 1024
H1 = LATENT_DIM * 10                        # 160 (logical)
H2 = LATENT_DIM * 5                         # 80  (logical)
D_OUT = 1                                   # logical output width

# lane-aligned (multiple-of-128) padded feature sizes used inside the kernel
H1_P = 256
H2_P = 128

NEG_SLOPE = 0.01  # torch.nn.LeakyReLU default


def _round_up(x, m):
    return (x + m - 1) // m * m


def _leaky_relu(x):
    return jnp.where(x > 0, x, NEG_SLOPE * x)


# ----------------------------------------------------------------------------
# Kernel: one batch-tile of the whole 3-layer MLP.
#   layers 1/2: bf16 x bf16 MXU matmuls, f32 accumulation, f32 bias/LeakyReLU
#   layer 3:    f32 VPU multiply + lane reduction (output width is 1), sigmoid
#               applied only to the real column.
# ----------------------------------------------------------------------------
def discriminator_kernel(x_ref, w1_ref, b1_ref, w2_ref, b2_ref,
                         w3r_ref, b3_ref, o_ref):
    xb = x_ref[...].astype(jnp.bfloat16)                          # [TB, D_IN]

    h1 = jnp.dot(xb, w1_ref[...],
                 preferred_element_type=jnp.float32) + b1_ref[...]
    h1 = _leaky_relu(h1)                                          # [TB, H1_P] f32

    h2 = jnp.dot(h1.astype(jnp.bfloat16), w2_ref[...],
                 preferred_element_type=jnp.float32) + b2_ref[...]
    h2 = _leaky_relu(h2)                                          # [TB, H2_P] f32

    # final layer: output width 1 -> weighted lane-reduction, no MXU / no pad
    logit = jnp.sum(h2 * w3r_ref[...], axis=1, keepdims=True) + b3_ref[0, 0]
    o_ref[...] = 1.0 / (1.0 + jnp.exp(-logit))                    # [TB, 1] f32


# ----------------------------------------------------------------------------
# Wrapper
# ----------------------------------------------------------------------------
def discriminator_forward(x_nchw, packed_params, *, tile_b=512):
    """x_nchw: [B, C, H, W] float32.  Returns [B, 1] float32."""
    B = x_nchw.shape[0]
    x2d = x_nchw.reshape(B, -1)                 # torch.nn.Flatten semantics
    if x2d.dtype != jnp.float32:
        x2d = x2d.astype(jnp.float32)
    w1, b1, w2, b2, w3r, b3 = packed_params

    # Batch tile: multiple of 8 sublanes, capped at tile_b.  Only tiny batches
    # (B < tb) are padded; otherwise Pallas clips the partial last block.
    tb = min(tile_b, _round_up(B, 8))
    rows = B
    if rows < tb:
        x2d = jnp.pad(x2d, ((0, tb - rows), (0, 0)))
        rows = tb
    grid = (pl.cdiv(rows, tb),)

    def const2d(shape):
        # same block every grid step -> fetched once, stays resident in VMEM
        return pl.BlockSpec(shape, lambda i: (0, 0))

    flops = 2 * rows * (D_IN * H1_P + H1_P * H2_P + H2_P)
    bytes_accessed = (rows * D_IN * 4 + rows * 4
                      + w1.size * 2 + w2.size * 2
                      + (b1.size + b2.size + w3r.size + b3.size) * 4)

    out = pl.pallas_call(
        discriminator_kernel,
        out_shape=jax.ShapeDtypeStruct((rows, 1), jnp.float32),
        grid=grid,
        in_specs=[
            pl.BlockSpec((tb, D_IN), lambda i: (i, 0)),   # activations: tiled over batch
            const2d((D_IN, H1_P)),                        # w1 (bf16)
            const2d((1, H1_P)),                           # b1 (f32)
            const2d((H1_P, H2_P)),                        # w2 (bf16)
            const2d((1, H2_P)),                           # b2 (f32)
            const2d((1, H2_P)),                           # w3 row (f32)
            pl.BlockSpec(memory_space=pltpu.MemorySpace.SMEM),  # b3 scalar
        ],
        out_specs=pl.BlockSpec((tb, 1), lambda i: (i, 0)),
        compiler_params=pltpu.CompilerParams(
            dimension_semantics=("parallel",),
            vmem_limit_bytes=32 * 1024 * 1024,
        ),
        cost_estimate=pl.CostEstimate(
            flops=flops, transcendentals=rows, bytes_accessed=bytes_accessed),
    )(x2d, w1, b1, w2, b2, w3r, b3)

    return out[:B]


# ----------------------------------------------------------------------------
# Parameters
# ----------------------------------------------------------------------------
def init_params(key):
    """Torch-Linear-style uniform init at the logical (unpadded) shapes, f32."""
    ks = jax.random.split(key, 6)

    def linear(kw, kb, fan_in, fan_out):
        bound = 1.0 / jnp.sqrt(jnp.float32(fan_in))
        w = jax.random.uniform(kw, (fan_in, fan_out), jnp.float32, -bound, bound)
        b = jax.random.uniform(kb, (1, fan_out), jnp.float32, -bound, bound)
        return w, b

    w1, b1 = linear(ks[0], ks[1], D_IN, H1)
    w2, b2 = linear(ks[2], ks[3], H1, H2)
    w3, b3 = linear(ks[4], ks[5], H2, D_OUT)
    return (w1, b1, w2, b2, w3, b3)


def pack_params(params):
    """Zero-pad to lane-aligned sizes; w1/w2 bf16, biases f32, w3 as an f32 row.

    Zero padding is exact: padded h1/h2 columns stay 0 through LeakyReLU, and
    padded w2 rows / w3-row entries contribute nothing downstream.
    """
    w1, b1, w2, b2, w3, b3 = params

    def pad2(a, rows, cols):
        return jnp.pad(a, ((0, rows - a.shape[0]), (0, cols - a.shape[1])))

    w1p = pad2(w1, D_IN, H1_P).astype(jnp.bfloat16)
    b1p = pad2(b1, 1, H1_P).astype(jnp.float32)
    w2p = pad2(w2, H1_P, H2_P).astype(jnp.bfloat16)
    b2p = pad2(b2, 1, H2_P).astype(jnp.float32)
    w3r = pad2(w3.T, 1, H2_P).astype(jnp.float32)   # [1, H2_P], row 0 = w3[:, 0]
    b3s = b3.reshape(1, 1).astype(jnp.float32)      # scalar for SMEM
    return (w1p, b1p, w2p, b2p, w3r, b3s)


# ----------------------------------------------------------------------------
# Pure-JAX reference (mirrors the kernel's bf16 matmul rounding)
# ----------------------------------------------------------------------------
def _reference_forward(x_nchw, params):
    w1, b1, w2, b2, w3, b3 = params
    bf = lambda a: a.astype(jnp.bfloat16)
    x = x_nchw.reshape(x_nchw.shape[0], -1).astype(jnp.float32)
    h1 = _leaky_relu(jnp.dot(bf(x), bf(w1), preferred_element_type=jnp.float32) + b1)
    h2 = _leaky_relu(jnp.dot(bf(h1), bf(w2), preferred_element_type=jnp.float32) + b2)
    logit = jnp.sum(h2 * w3[:, 0][None, :], axis=1, keepdims=True) + b3
    return 1.0 / (1.0 + jnp.exp(-logit))


if __name__ == "__main__":
    key = jax.random.PRNGKey(0)
    k_x, k_p = jax.random.split(key)

    x = jax.random.normal(k_x, (2, CHANNELS, IMAGE_SIZE, IMAGE_SIZE), jnp.float32)
    params = init_params(k_p)
    packed = pack_params(params)

    out = discriminator_forward(x, packed)
    out = jax.block_until_ready(out)

    ref = _reference_forward(x, params)
    assert out.shape == (2, 1)
    assert jnp.allclose(out, ref, atol=2e-3, rtol=2e-3)

    print("KERNEL_OK")
</pallas_src>

<mosaic_0001>
module attributes {stable_mosaic.version = 11 : i64} {
  func.func @discriminator_kernel(%arg0: i32, %arg1: memref<8x1024xf32, #tpu.memory_space<vmem>>, %arg2: memref<1024x256xbf16, #tpu.memory_space<vmem>>, %arg3: memref<1x256xf32, #tpu.memory_space<vmem>>, %arg4: memref<256x128xbf16, #tpu.memory_space<vmem>>, %arg5: memref<1x128xf32, #tpu.memory_space<vmem>>, %arg6: memref<1x128xf32, #tpu.memory_space<vmem>>, %arg7: memref<1x1xf32, #tpu.memory_space<smem>>, %arg8: memref<8x1xf32, #tpu.memory_space<vmem>>) attributes {dimension_semantics = [#tpu.dimension_semantics<parallel>], iteration_bounds = array<i64: 1>, scalar_prefetch = 0 : i64, scratch_operands = 0 : i64, tpu.core_type = #tpu.core_type<tc>, window_params = [{transform_indices = @transform_0, window_bounds = array<i64: 8, 1024>}, {pipeline_mode = #tpu.pipeline_mode<synchronous>, transform_indices = @transform_1, window_bounds = array<i64: 1024, 256>}, {pipeline_mode = #tpu.pipeline_mode<synchronous>, transform_indices = @transform_2, window_bounds = array<i64: 1, 256>}, {pipeline_mode = #tpu.pipeline_mode<synchronous>, transform_indices = @transform_3, window_bounds = array<i64: 256, 128>}, {pipeline_mode = #tpu.pipeline_mode<synchronous>, transform_indices = @transform_4, window_bounds = array<i64: 1, 128>}, {pipeline_mode = #tpu.pipeline_mode<synchronous>, transform_indices = @transform_5, window_bounds = array<i64: 1, 128>}, {transform_indices = @transform_6, window_bounds = array<i64: 1, 1>}, {transform_indices = @transform_7, window_bounds = array<i64: 8, 1>}]} {
    %c0 = arith.constant 0 : index
    %c0_0 = arith.constant 0 : index
    %0 = vector.load %arg1[%c0, %c0_0] : memref<8x1024xf32, #tpu.memory_space<vmem>>, vector<8x1024xf32>
    %1 = arith.truncf %0 : vector<8x1024xf32> to vector<8x1024xbf16>
    %c0_1 = arith.constant 0 : index
    %c0_2 = arith.constant 0 : index
    %2 = vector.load %arg2[%c0_1, %c0_2] : memref<1024x256xbf16, #tpu.memory_space<vmem>>, vector<1024x256xbf16>
    %cst = arith.constant dense<0.000000e+00> : vector<8x256xf32>
    %3 = tpu.matmul %1, %2, %cst {dimension_numbers = #tpu.dot_dimension_numbers<[1], [0], [0], [1], [0, 0, 1, 1], [], []>} : vector<8x1024xbf16>, vector<1024x256xbf16>, vector<8x256xf32> -> vector<8x256xf32>
    %c0_3 = arith.constant 0 : index
    %c0_4 = arith.constant 0 : index
    %4 = vector.load %arg3[%c0_3, %c0_4] : memref<1x256xf32, #tpu.memory_space<vmem>>, vector<1x256xf32>
    %5 = vector.broadcast %4 : vector<1x256xf32> to vector<8x256xf32>
    %6 = arith.addf %3, %5 : vector<8x256xf32>
    %cst_5 = arith.constant 0.000000e+00 : f32
    %7 = vector.broadcast %cst_5 : f32 to vector<8x256xf32>
    %8 = arith.cmpf ogt, %6, %7 : vector<8x256xf32>
    %cst_6 = arith.constant 0.00999999977 : f32
    %9 = vector.broadcast %cst_6 : f32 to vector<8x256xf32>
    %10 = arith.mulf %9, %6 : vector<8x256xf32>
    %11 = arith.select %8, %6, %10 : vector<8x256xi1>, vector<8x256xf32>
    %12 = arith.truncf %11 : vector<8x256xf32> to vector<8x256xbf16>
    %c0_7 = arith.constant 0 : index
    %c0_8 = arith.constant 0 : index
    %13 = vector.load %arg4[%c0_7, %c0_8] : memref<256x128xbf16, #tpu.memory_space<vmem>>, vector<256x128xbf16>
    %cst_9 = arith.constant dense<0.000000e+00> : vector<8x128xf32>
    %14 = tpu.matmul %12, %13, %cst_9 {dimension_numbers = #tpu.dot_dimension_numbers<[1], [0], [0], [1], [0, 0, 1, 1], [], []>} : vector<8x256xbf16>, vector<256x128xbf16>, vector<8x128xf32> -> vector<8x128xf32>
    %c0_10 = arith.constant 0 : index
    %c0_11 = arith.constant 0 : index
    %15 = vector.load %arg5[%c0_10, %c0_11] : memref<1x128xf32, #tpu.memory_space<vmem>>, vector<1x128xf32>
    %16 = vector.broadcast %15 : vector<1x128xf32> to vector<8x128xf32>
    %17 = arith.addf %14, %16 : vector<8x128xf32>
    %cst_12 = arith.constant 0.000000e+00 : f32
    %18 = vector.broadcast %cst_12 : f32 to vector<8x128xf32>
    %19 = arith.cmpf ogt, %17, %18 : vector<8x128xf32>
    %cst_13 = arith.constant 0.00999999977 : f32
    %20 = vector.broadcast %cst_13 : f32 to vector<8x128xf32>
    %21 = arith.mulf %20, %17 : vector<8x128xf32>
    %22 = arith.select %19, %17, %21 : vector<8x128xi1>, vector<8x128xf32>
    %c0_14 = arith.constant 0 : index
    %c0_15 = arith.constant 0 : index
    %23 = vector.load %arg6[%c0_14, %c0_15] : memref<1x128xf32, #tpu.memory_space<vmem>>, vector<1x128xf32>
    %24 = vector.broadcast %23 : vector<1x128xf32> to vector<8x128xf32>
    %25 = arith.mulf %22, %24 : vector<8x128xf32>
    %cst_16 = arith.constant dense<0.000000e+00> : vector<8xf32>
    %26 = vector.multi_reduction <add>, %25, %cst_16 [1] : vector<8x128xf32> to vector<8xf32>
    %27 = vector.shape_cast %26 : vector<8xf32> to vector<8x1xf32>
    %c0_17 = arith.constant 0 : index
    %c0_18 = arith.constant 0 : index
    %28 = memref.load %arg7[%c0_17, %c0_18] : memref<1x1xf32, #tpu.memory_space<smem>>
    %29 = vector.broadcast %28 : f32 to vector<8x1xf32>
    %30 = arith.addf %27, %29 : vector<8x1xf32>
    %cst_19 = arith.constant 0.000000e+00 : f32
    %31 = vector.broadcast %cst_19 : f32 to vector<8x1xf32>
    %32 = arith.subf %31, %30 : vector<8x1xf32>
    %33 = math.exp %32 : vector<8x1xf32>
    %cst_20 = arith.constant 1.000000e+00 : f32
    %34 = vector.broadcast %cst_20 : f32 to vector<8x1xf32>
    %35 = arith.addf %34, %33 : vector<8x1xf32>
    %cst_21 = arith.constant 1.000000e+00 : f32
    %36 = vector.broadcast %cst_21 : f32 to vector<8x1xf32>
    %37 = arith.divf %36, %35 : vector<8x1xf32>
    %c0_22 = arith.constant 0 : index
    %c0_23 = arith.constant 0 : index
    %38 = vector.load %arg8[%c0_22, %c0_23] : memref<8x1xf32, #tpu.memory_space<vmem>>, vector<8x1xf32>
    tpu.vector_store %arg8[%c0_22, %c0_23], %37 {strides = array<i32>} : memref<8x1xf32, #tpu.memory_space<vmem>>, vector<8x1xf32>,
    return
  }
  func.func @transform_0(%arg0: i32) -> (i32, i32) {
    %c0_i32 = arith.constant 0 : i32
    %c0_i32_0 = arith.constant 0 : i32
    return %arg0, %c0_i32 : i32, i32
  }
  func.func @transform_1(%arg0: i32) -> (i32, i32) {
    %c0_i32 = arith.constant 0 : i32
    %c0_i32_0 = arith.constant 0 : i32
    %c0_i32_1 = arith.constant 0 : i32
    return %c0_i32, %c0_i32_0 : i32, i32
  }
  func.func @transform_2(%arg0: i32) -> (i32, i32) {
    %c0_i32 = arith.constant 0 : i32
    %c0_i32_0 = arith.constant 0 : i32
    %c0_i32_1 = arith.constant 0 : i32
    return %c0_i32, %c0_i32_0 : i32, i32
  }
  func.func @transform_3(%arg0: i32) -> (i32, i32) {
    %c0_i32 = arith.constant 0 : i32
    %c0_i32_0 = arith.constant 0 : i32
    %c0_i32_1 = arith.constant 0 : i32
    return %c0_i32, %c0_i32_0 : i32, i32
  }
  func.func @transform_4(%arg0: i32) -> (i32, i32) {
    %c0_i32 = arith.constant 0 : i32
    %c0_i32_0 = arith.constant 0 : i32
    %c0_i32_1 = arith.constant 0 : i32
    return %c0_i32, %c0_i32_0 : i32, i32
  }
  func.func @transform_5(%arg0: i32) -> (i32, i32) {
    %c0_i32 = arith.constant 0 : i32
    %c0_i32_0 = arith.constant 0 : i32
    %c0_i32_1 = arith.constant 0 : i32
    return %c0_i32, %c0_i32_0 : i32, i32
  }
  func.func @transform_6(%arg0: i32) -> (i32, i32) {
    %c0_i32 = arith.constant 0 : i32
    %c0_i32_0 = arith.constant 0 : i32
    %c0_i32_1 = arith.constant 0 : i32
    return %c0_i32, %c0_i32_0 : i32, i32
  }
  func.func @transform_7(%arg0: i32) -> (i32, i32) {
    %c0_i32 = arith.constant 0 : i32
    %c0_i32_0 = arith.constant 0 : i32
    return %arg0, %c0_i32 : i32, i32
  }
}

</mosaic_0001>

<bundles_post_ra>
// kernel: tpu_custom_call.1
= control target key start
LH: loop header
LB: loop body
LE: loop exit
PB: predicated region body
PF: predicated region fallthrough
CT: control target
= control target key end

     0   :  { %13 = vsyncpa [#allocation4], 0  ;;  %s1807_s0 = inlined_call_operand.hbm [shape: f32[8,1024], index: 0, kind: input, shape index: {}]   ;;  %s1808_s1 = inlined_call_operand.hbm [shape: bf16[1024,256], index: 1, kind: input, shape index: {}]   ;;  %s1809_s2 = inlined_call_operand.vmem [shape: f32[1,256], index: 2, kind: input, shape index: {}]   ;;  %s1810_s3 = inlined_call_operand.hbm [shape: bf16[256,128], index: 3, kind: input, shape index: {}]   ;;  %s1811_s4 = inlined_call_operand.vmem [shape: f32[1,128], index: 4, kind: input, shape index: {}]   ;;  %s1812_s5 = inlined_call_operand.vmem [shape: f32[1,128], index: 5, kind: input, shape index: {}]   ;;  %s1813_s6 = inlined_call_operand.<no memory space> [shape: f32[1,1], index: 6, kind: input, shape index: {}]   ;;  %s1814_s7 = inlined_call_operand.vmem [shape: f32[8,1], index: 7, kind: output, shape index: {}]  }
   0x1   :  { %14 = vsyncpa [#allocation6], 0  ;;  %s1709_s24 = smov [#allocation5]   ;;  %s1639_s28 = scalar_lea.hbm %s1808_s1, 16384 }
   0x2   :  { %s30_s25 = sshll.u32 %s1709_s24, 4  ;;  %p1640_p0 = scmp.ne.s32.totalorder %s1808_s1, %s1639_s28  ;;  %s31_s25 = int_to_ptr.vmem [resolvable:$true] %s30_s25 }
   0x3   :  { %p1643_p1 = scmp.lt.u32.totalorder %s1639_s28, %s1808_s1 }
   0x5   :  { %p1645_p2 = pnand %p1643_p1, %p1640_p0 }
   0x7   :  { %1648 = shalt.err (!%p1645_p2)
}
   0x8   :  { %s1649_s10 = scalar_lea.vmem %s31_s25, 16384  ;;  %p1654_p4 = scmp.lt.s32.totalorder %s31_s25, %s31_s25 }
   0x9   :  { %p1650_p3 = scmp.ne.s32.totalorder %s31_s25, %s1649_s10  ;;  %p1655_p5 = scmp.lt.s32.totalorder %s1649_s10, %s1649_s10 }
   0xb   :  { %p1656_p6 = por %p1655_p5, %p1654_p4 }
   0xd   :  { %p1657_p7 = pnand %p1656_p6, %p1650_p3 }
   0xf   :  { %1660 = shalt.err (!%p1657_p7)
}
  0x10   :  { %s1710_s11 = smov 128   ;;  %s1711_s12 = smov 8  }
  0x11   :  { %36 = dma.hbm_to_vmem [thread:$0]  %s1808_s1, 16384, %s31_s25, [#allocation6], %s1710_s11, %s1710_s11, %s1711_s12  }
  0x12   :  { %s1712_s15 = smov [#allocation3]   ;;  %s1713_s17 = smov [#allocation7]  }
  0x13   :  { %s21_s16 = sshll.u32 %s1712_s15, 4  ;;  %s44_s18 = sshll.u32 %s1713_s17, 4  ;;  %s22_s16 = int_to_ptr.vmem [resolvable:$true] %s21_s16  ;;  %s45_s18 = int_to_ptr.vmem [resolvable:$true] %s44_s18 }
  0x14   :  { %s1661_s21 = scalar_lea.hbm %s1807_s0, 1024 }
  0x15   :  { %p1662_p8 = scmp.ne.s32.totalorder %s1807_s0, %s1661_s21  ;;  %p1665_p9 = scmp.lt.u32.totalorder %s1661_s21, %s1807_s0 }
  0x17   :  { %p1667_p10 = pnand %p1665_p9, %p1662_p8 }
  0x19   :  { %1670 = shalt.err (!%p1667_p10)
}
  0x1a   :  { %s1671_s1 = scalar_lea.vmem %s22_s16, 1024  ;;  %p1676_p12 = scmp.lt.s32.totalorder %s22_s16, %s22_s16 }
  0x1b   :  { %p1672_p11 = scmp.ne.s32.totalorder %s22_s16, %s1671_s1  ;;  %p1677_p13 = scmp.lt.s32.totalorder %s1671_s1, %s1671_s1 }
  0x1d   :  { %p1678_p0 = por %p1677_p13, %p1676_p12 }
  0x1f   :  { %p1679_p1 = pnand %p1678_p0, %p1672_p11 }
  0x21   :  { %1682 = shalt.err (!%p1679_p1)
}
  0x22   :  { %24 = dma.hbm_to_vmem [thread:$0]  %s1807_s0, 1024, %s22_s16, [#allocation4]  }
  0x23   :  { %s1683_s30 = scalar_lea.hbm %s1810_s3, 2048 }
  0x24   :  { %p1684_p2 = scmp.ne.s32.totalorder %s1810_s3, %s1683_s30  ;;  %p1687_p3 = scmp.lt.u32.totalorder %s1683_s30, %s1810_s3 }
  0x26   :  { %p1689_p4 = pnand %p1687_p3, %p1684_p2 }
  0x28   :  { %1692 = shalt.err (!%p1689_p4)
}
  0x29   :  { %s1693_s12 = scalar_lea.vmem %s45_s18, 2048  ;;  %p1698_p6 = scmp.lt.s32.totalorder %s45_s18, %s45_s18 }
  0x2a   :  { %p1694_p5 = scmp.ne.s32.totalorder %s45_s18, %s1693_s12  ;;  %p1699_p7 = scmp.lt.s32.totalorder %s1693_s12, %s1693_s12 }
  0x2c   :  { %p1700_p8 = por %p1699_p7, %p1698_p6 }
  0x2e   :  { %p1701_p9 = pnand %p1700_p8, %p1694_p5 }
  0x30   :  { %1704 = shalt.err (!%p1701_p9)
}
  0x31   :  { %s1714_s0 = smov 64   ;;  %s1715_s13 = smov 4  }
  0x32   :  { %50 = dma.hbm_to_vmem [thread:$0]  %s1810_s3, 2048, %s45_s18, [#allocation6], %s1714_s0, %s1714_s0, %s1715_s13  }
  0x33   :  { %1705 = dma.done.wait [#allocation4], 1024  }
  0x34   :  { %1706 = vsyncadd [#allocation4], 4294966272 }
  0x35   :  { %1707 = dma.done.wait [#allocation6], 18432  }
  0x36   :  { %1708 = vsyncadd [#allocation6], 4294948864  ;;  %v1427_v0 = vld [vmem:[#allocation5 + $0x4] ss:$8 sps:$4 sm:$0xff]   ;;  %v1431_v2 = vld [vmem:[#allocation5] ss:$8 sps:$4 sm:$0xff]  }
  0x37   :  { %v1429_v1 = vld [vmem:[#allocation5 + $0x204] ss:$8 sps:$4 sm:$0xff]   ;;  %863 = vmatprep.subr.bf16.mxu1 %v1427_v0  ;;  %v1432_v3 = vld [vmem:[#allocation5 + $0x200] ss:$8 sps:$4 sm:$0xff]   ;;  %v1433_v4 = vld [vmem:[#allocation5 + $0x14] ss:$8 sps:$4 sm:$0xff]  }
  0x38   :  { %945 = vmatprep.subr.bf16.mxu0 %v1429_v1  ;;  %864 = vmatpush1.bf16.msra.mxu1 %v1431_v2  ;;  %v1435_v5 = vld [vmem:[#allocation5 + $0x214] ss:$8 sps:$4 sm:$0xff]   ;;  %v1437_v6 = vld [vmem:[#allocation5 + $0x10] ss:$8 sps:$4 sm:$0xff]   ;;  %v1439_v8 = vld [vmem:[#allocation5 + $0x24] ss:$8 sps:$4 sm:$0xff]  }
  0x39   :  { %946 = vmatpush1.bf16.msra.mxu0 %v1432_v3  ;;  %865 = vmatprep.subr.bf16.mxu1 %v1433_v4  ;;  %v1438_v7 = vld [vmem:[#allocation5 + $0x210] ss:$8 sps:$4 sm:$0xff]   ;;  %v1441_v9 = vld [vmem:[#allocation5 + $0x224] ss:$8 sps:$4 sm:$0xff]   ;;  %v1443_v10 = vld [vmem:[#allocation5 + $0x20] ss:$8 sps:$4 sm:$0xff]  }
  0x3a   :  { %947 = vmatprep.subr.bf16.mxu0 %v1435_v5  ;;  %v1444_v11 = vld [vmem:[#allocation5 + $0x220] ss:$8 sps:$4 sm:$0xff]   ;;  %v1445_v12 = vld [vmem:[#allocation5 + $0x34] ss:$8 sps:$4 sm:$0xff]   ;;  %v1449_v14 = vld [vmem:[#allocation5 + $0x30] ss:$8 sps:$4 sm:$0xff]  }
  0x3b   :  { %v1447_v13 = vld [vmem:[#allocation5 + $0x234] ss:$8 sps:$4 sm:$0xff]   ;;  %v1450_v15 = vld [vmem:[#allocation5 + $0x230] ss:$8 sps:$4 sm:$0xff]   ;;  %v1451_v16 = vld [vmem:[#allocation5 + $0x44] ss:$8 sps:$4 sm:$0xff]  }
  0x3c   :  { %866 = vmatpush1.bf16.msra.mxu1 %v1437_v6  ;;  %v1453_v17 = vld [vmem:[#allocation5 + $0x244] ss:$8 sps:$4 sm:$0xff]   ;;  %v1455_v18 = vld [vmem:[#allocation5 + $0x40] ss:$8 sps:$4 sm:$0xff]   ;;  %v1457_v20 = vld [vmem:[#allocation5 + $0x54] ss:$8 sps:$4 sm:$0xff]  }
  0x3d   :  { %948 = vmatpush1.bf16.msra.mxu0 %v1438_v7  ;;  %867 = vmatprep.subr.bf16.mxu1 %v1439_v8  ;;  %v1456_v19 = vld [vmem:[#allocation5 + $0x240] ss:$8 sps:$4 sm:$0xff]   ;;  %v1459_v21 = vld [vmem:[#allocation5 + $0x254] ss:$8 sps:$4 sm:$0xff]   ;;  %v1461_v22 = vld [vmem:[#allocation5 + $0x50] ss:$8 sps:$4 sm:$0xff]  }
  0x3e   :  { %949 = vmatprep.subr.bf16.mxu0 %v1441_v9  ;;  %v1462_v23 = vld [vmem:[#allocation5 + $0x250] ss:$8 sps:$4 sm:$0xff]   ;;  %v1463_v24 = vld [vmem:[#allocation5 + $0x64] ss:$8 sps:$4 sm:$0xff]   ;;  %v1467_v26 = vld [vmem:[#allocation5 + $0x60] ss:$8 sps:$4 sm:$0xff]  }
  0x3f   :  { %v1465_v25 = vld [vmem:[#allocation5 + $0x264] ss:$8 sps:$4 sm:$0xff]   ;;  %v1468_v27 = vld [vmem:[#allocation5 + $0x260] ss:$8 sps:$4 sm:$0xff]   ;;  %v1469_v28 = vld [vmem:[#allocation5 + $0x74] ss:$8 sps:$4 sm:$0xff]  }
  0x40   :  { %868 = vmatpush1.bf16.msra.mxu1 %v1443_v10  ;;  %v1471_v29 = vld [vmem:[#allocation5 + $0x274] ss:$8 sps:$4 sm:$0xff]   ;;  %v1473_v30 = vld [vmem:[#allocation5 + $0x70] ss:$8 sps:$4 sm:$0xff]   ;;  %v1475_v32 = vld [vmem:[#allocation5 + $0x84] ss:$8 sps:$4 sm:$0xff]  }
  0x41   :  { %950 = vmatpush1.bf16.msra.mxu0 %v1444_v11  ;;  %869 = vmatprep.subr.bf16.mxu1 %v1445_v12  ;;  %v1474_v31 = vld [vmem:[#allocation5 + $0x270] ss:$8 sps:$4 sm:$0xff]   ;;  %v1477_v33 = vld [vmem:[#allocation5 + $0x284] ss:$8 sps:$4 sm:$0xff]   ;;  %v1479_v34 = vld [vmem:[#allocation5 + $0x80] ss:$8 sps:$4 sm:$0xff]  }
  0x42   :  { %951 = vmatprep.subr.bf16.mxu0 %v1447_v13  ;;  %v1480_v35 = vld [vmem:[#allocation5 + $0x280] ss:$8 sps:$4 sm:$0xff]   ;;  %v1481_v36 = vld [vmem:[#allocation5 + $0x94] ss:$8 sps:$4 sm:$0xff]   ;;  %v1485_v38 = vld [vmem:[#allocation5 + $0x90] ss:$8 sps:$4 sm:$0xff]  }
  0x43   :  { %v1483_v37 = vld [vmem:[#allocation5 + $0x294] ss:$8 sps:$4 sm:$0xff]   ;;  %v1486_v39 = vld [vmem:[#allocation5 + $0x290] ss:$8 sps:$4 sm:$0xff]   ;;  %v1487_v40 = vld [vmem:[#allocation5 + $0xa4] ss:$8 sps:$4 sm:$0xff]  }
  0x44   :  { %870 = vmatpush1.bf16.msra.mxu1 %v1449_v14  ;;  %v1489_v41 = vld [vmem:[#allocation5 + $0x2a4] ss:$8 sps:$4 sm:$0xff]   ;;  %v1491_v42 = vld [vmem:[#allocation5 + $0xa0] ss:$8 sps:$4 sm:$0xff]   ;;  %v1493_v44 = vld [vmem:[#allocation5 + $0xb4] ss:$8 sps:$4 sm:$0xff]  }
  0x45   :  { %952 = vmatpush1.bf16.msra.mxu0 %v1450_v15  ;;  %871 = vmatprep.subr.bf16.mxu1 %v1451_v16  ;;  %v1492_v43 = vld [vmem:[#allocation5 + $0x2a0] ss:$8 sps:$4 sm:$0xff]   ;;  %v1495_v45 = vld [vmem:[#allocation5 + $0x2b4] ss:$8 sps:$4 sm:$0xff]   ;;  %v1497_v47 = vld [vmem:[#allocation5 + $0xb0] ss:$8 sps:$4 sm:$0xff]  }
  0x46   :  { %953 = vmatprep.subr.bf16.mxu0 %v1453_v17  ;;  %v68_v46 = vld [vmem:[#allocation3 + $0x8] sm:$0xff]  ;;  %v1498_v49 = vld [vmem:[#allocation5 + $0x2b0] ss:$8 sps:$4 sm:$0xff]   ;;  %v1505_v56 = vld [vmem:[#allocation5 + $0xd4] ss:$8 sps:$4 sm:$0xff]   ;;  %vm1232_vm3 = vcmask 7168  }
  0x47   :  { %v76_v48 = vpack.c.bf16 %v68_v46, %v68_v46  ;;  %v72_v50 = vld [vmem:[#allocation3 + $0x28] sm:$0xff]  ;;  %v1507_v57 = vld [vmem:[#allocation5 + $0x2d4] ss:$8 sps:$4 sm:$0xff]   ;;  %v1509_v58 = vld [vmem:[#allocation5 + $0xd0] ss:$8 sps:$4 sm:$0xff]  }
  0x48   :  { %872 = vmatpush1.bf16.msra.mxu1 %v1455_v18  ;;  %v1499_v51 = vld [vmem:[#allocation5 + $0xc4] ss:$8 sps:$4 sm:$0xff]   ;;  %v80_v53 = vpack.c.bf16 %v72_v50, %v72_v50  ;;  %v1503_v54 = vld [vmem:[#allocation5 + $0xc0] ss:$8 sps:$4 sm:$0xff]   ;;  %v1510_v59 = vld [vmem:[#allocation5 + $0x2d0] ss:$8 sps:$4 sm:$0xff]  }
  0x49   :  { %954 = vmatpush1.bf16.msra.mxu0 %v1456_v19  ;;  %873 = vmatprep.subr.bf16.mxu1 %v1457_v20  ;;  %v1501_v52 = vld [vmem:[#allocation5 + $0x2c4] ss:$8 sps:$4 sm:$0xff]   ;;  %v1504_v55 = vld [vmem:[#allocation5 + $0x2c0] ss:$8 sps:$4 sm:$0xff]   ;;  %v1517_v0 = vld [vmem:[#allocation5 + $0xf4] ss:$8 sps:$4 sm:$0xff]  }
  0x4a   :  { %955 = vmatprep.subr.bf16.mxu0 %v1459_v21  ;;  %895 = vmatprep.mubr.bf16.mxu1 %v76_v48  ;;  %v1511_v60 = vld [vmem:[#allocation5 + $0xe4] ss:$8 sps:$4 sm:$0xff]   ;;  %v1515_v62 = vld [vmem:[#allocation5 + $0xe0] ss:$8 sps:$4 sm:$0xff]   ;;  %v1519_v1 = vld [vmem:[#allocation5 + $0x2f4] ss:$8 sps:$4 sm:$0xff]  }
  0x4b   :  { %977 = vmatprep.mubr.bf16.mxu0 %v80_v53  ;;  %v1513_v61 = vld [vmem:[#allocation5 + $0x2e4] ss:$8 sps:$4 sm:$0xff]   ;;  %v1516_v63 = vld [vmem:[#allocation5 + $0x2e0] ss:$8 sps:$4 sm:$0xff]   ;;  %v1521_v2 = vld [vmem:[#allocation5 + $0xf0] ss:$8 sps:$4 sm:$0xff]  }
  0x4c   :  { %874 = vmatpush1.bf16.msra.mxu1 %v1461_v22  ;;  %v1522_v3 = vld [vmem:[#allocation5 + $0x2f0] ss:$8 sps:$4 sm:$0xff]   ;;  %v1525_v4 = vld [vmem:[#allocation5 + $0x104] ss:$8 sps:$4 sm:$0xff]   ;;  %v1523_v8 = vld [vmem:[#allocation5 + $0x100] ss:$8 sps:$4 sm:$0xff]  }
  0x4d   :  { %956 = vmatpush1.bf16.msra.mxu0 %v1462_v23  ;;  %875 = vmatprep.subr.bf16.mxu1 %v1463_v24  ;;  %v67_v5 = vld [vmem:[#allocation3] sm:$0xff]  ;;  %v1531_v12 = vld [vmem:[#allocation5 + $0x114] ss:$8 sps:$4 sm:$0xff]   ;;  %v1529_v14 = vld [vmem:[#allocation5 + $0x110] ss:$8 sps:$4 sm:$0xff]  }
  0x4e   :  { %957 = vmatprep.subr.bf16.mxu0 %v1465_v25  ;;  %v71_v6 = vld [vmem:[#allocation3 + $0x20] sm:$0xff]  ;;  %v75_v10 = vpack.c.bf16 %v67_v5, %v67_v5  ;;  %v1534_v13 = vld [vmem:[#allocation5 + $0x314] ss:$8 sps:$4 sm:$0xff]   ;;  %v1532_v15 = vld [vmem:[#allocation5 + $0x310] ss:$8 sps:$4 sm:$0xff]  }
  0x4f   :  { %v1528_v7 = vld [vmem:[#allocation5 + $0x304] ss:$8 sps:$4 sm:$0xff]   ;;  %v1526_v9 = vld [vmem:[#allocation5 + $0x300] ss:$8 sps:$4 sm:$0xff]   ;;  %v79_v11 = vpack.c.bf16 %v71_v6, %v71_v6  ;;  %v1543_v20 = vld [vmem:[#allocation5 + $0x134] ss:$8 sps:$4 sm:$0xff]  }
  0x50   :  { %876 = vmatpush1.bf16.msra.mxu1 %v1467_v26  ;;  %v1537_v16 = vld [vmem:[#allocation5 + $0x124] ss:$8 sps:$4 sm:$0xff]   ;;  %v1535_v18 = vld [vmem:[#allocation5 + $0x120] ss:$8 sps:$4 sm:$0xff]   ;;  %v1546_v21 = vld [vmem:[#allocation5 + $0x334] ss:$8 sps:$4 sm:$0xff]  }
  0x51   :  { %958 = vmatpush1.bf16.msra.mxu0 %v1468_v27  ;;  %877 = vmatprep.subr.bf16.mxu1 %v1469_v28  ;;  %v1540_v17 = vld [vmem:[#allocation5 + $0x324] ss:$8 sps:$4 sm:$0xff]   ;;  %v1538_v19 = vld [vmem:[#allocation5 + $0x320] ss:$8 sps:$4 sm:$0xff]   ;;  %v1541_v22 = vld [vmem:[#allocation5 + $0x130] ss:$8 sps:$4 sm:$0xff]  }
  0x52   :  { %959 = vmatprep.subr.bf16.mxu0 %v1471_v29  ;;  %v1544_v23 = vld [vmem:[#allocation5 + $0x330] ss:$8 sps:$4 sm:$0xff]   ;;  %v1549_v24 = vld [vmem:[#allocation5 + $0x144] ss:$8 sps:$4 sm:$0xff]   ;;  %v1547_v26 = vld [vmem:[#allocation5 + $0x140] ss:$8 sps:$4 sm:$0xff]  }
  0x53   :  { %v1552_v25 = vld [vmem:[#allocation5 + $0x344] ss:$8 sps:$4 sm:$0xff]   ;;  %v1550_v27 = vld [vmem:[#allocation5 + $0x340] ss:$8 sps:$4 sm:$0xff]   ;;  %v1555_v28 = vld [vmem:[#allocation5 + $0x154] ss:$8 sps:$4 sm:$0xff]  }
  0x54   :  { %878 = vmatpush1.bf16.msra.mxu1 %v1473_v30  ;;  %v1558_v29 = vld [vmem:[#allocation5 + $0x354] ss:$8 sps:$4 sm:$0xff]   ;;  %v1553_v30 = vld [vmem:[#allocation5 + $0x150] ss:$8 sps:$4 sm:$0xff]   ;;  %v1571_v46 = vld [vmem:[#allocation5 + $0x180] ss:$8 sps:$4 sm:$0xff]  }
  0x55   :  { %960 = vmatpush1.bf16.msra.mxu0 %v1474_v31  ;;  %879 = vmatprep.subr.bf16.mxu1 %v1475_v32  ;;  %v1556_v31 = vld [vmem:[#allocation5 + $0x350] ss:$8 sps:$4 sm:$0xff]   ;;  %v1561_v32 = vld [vmem:[#allocation5 + $0x164] ss:$8 sps:$4 sm:$0xff]   ;;  %v1579_v48 = vld [vmem:[#allocation5 + $0x194] ss:$8 sps:$4 sm:$0xff]  }
  0x56   :  { %961 = vmatprep.subr.bf16.mxu0 %v1477_v33  ;;  %v1564_v33 = vld [vmem:[#allocation5 + $0x364] ss:$8 sps:$4 sm:$0xff]   ;;  %v1577_v50 = vld [vmem:[#allocation5 + $0x190] ss:$8 sps:$4 sm:$0xff]   ;;  %v1607_v6 = vld [vmem:[#allocation5 + $0x1e0] ss:$8 sps:$4 sm:$0xff]  }
  0x57   :  { %v1588_v53 = vld [vmem:[#allocation5 + $0x3a4] ss:$8 sps:$4 sm:$0xff]  }
  0x58   :  { %880 = vmatpush1.bf16.msra.mxu1 %v1479_v34  ;;  %v70_v34 = vld [vmem:[#allocation3 + $0x18] sm:$0xff]  ;;  %v1612_v5 = vld [vmem:[#allocation5 + $0x3e4] ss:$8 sps:$4 sm:$0xff]  }
  0x59   :  { %962 = vmatpush1.bf16.msra.mxu0 %v1480_v35  ;;  %881 = vmatprep.subr.bf16.mxu1 %v1481_v36  ;;  %v1559_v35 = vld [vmem:[#allocation5 + $0x160] ss:$8 sps:$4 sm:$0xff]  }
  0x5a   :  { %963 = vmatprep.subr.bf16.mxu0 %v1483_v37  ;;  %v1562_v36 = vld [vmem:[#allocation5 + $0x360] ss:$8 sps:$4 sm:$0xff]   ;;  %v78_v37 = vpack.c.bf16 %v70_v34, %v70_v34 }
  0x5c   :  { %882 = vmatpush1.bf16.msra.mxu1 %v1485_v38  ;;  %v74_v38 = vld [vmem:[#allocation3 + $0x38] sm:$0xff] }
  0x5d   :  { %964 = vmatpush1.bf16.msra.mxu0 %v1486_v39  ;;  %883 = vmatprep.subr.bf16.mxu1 %v1487_v40  ;;  %v1567_v39 = vld [vmem:[#allocation5 + $0x174] ss:$8 sps:$4 sm:$0xff]   ;;  %v82_v40 = vpack.c.bf16 %v74_v38, %v74_v38 }
  0x5e   :  { %965 = vmatprep.subr.bf16.mxu0 %v1489_v41  ;;  %v1570_v41 = vld [vmem:[#allocation5 + $0x374] ss:$8 sps:$4 sm:$0xff]  }
  0x60   :  { %884 = vmatpush1.bf16.msra.mxu1 %v1491_v42  ;;  %v1565_v42 = vld [vmem:[#allocation5 + $0x170] ss:$8 sps:$4 sm:$0xff]  }
  0x61   :  { %966 = vmatpush1.bf16.msra.mxu0 %v1492_v43  ;;  %885 = vmatprep.subr.bf16.mxu1 %v1493_v44  ;;  %v1568_v43 = vld [vmem:[#allocation5 + $0x370] ss:$8 sps:$4 sm:$0xff]   ;;  %v1573_v44 = vld [vmem:[#allocation5 + $0x184] ss:$8 sps:$4 sm:$0xff]  }
  0x62   :  { %967 = vmatprep.subr.bf16.mxu0 %v1495_v45  ;;  %v1576_v45 = vld [vmem:[#allocation5 + $0x384] ss:$8 sps:$4 sm:$0xff]  }
  0x64   :  { %886 = vmatpush1.bf16.msra.mxu1 %v1497_v47  ;;  %v1574_v47 = vld [vmem:[#allocation5 + $0x380] ss:$8 sps:$4 sm:$0xff]  }
  0x65   :  { %968 = vmatpush1.bf16.msra.mxu0 %v1498_v49  ;;  %887 = vmatprep.subr.bf16.mxu1 %v1499_v51  ;;  %v1582_v49 = vld [vmem:[#allocation5 + $0x394] ss:$8 sps:$4 sm:$0xff]   ;;  %v1580_v51 = vld [vmem:[#allocation5 + $0x390] ss:$8 sps:$4 sm:$0xff]  }
  0x66   :  { %969 = vmatprep.subr.bf16.mxu0 %v1501_v52  ;;  %v1585_v52 = vld [vmem:[#allocation5 + $0x1a4] ss:$8 sps:$4 sm:$0xff]  }
  0x68   :  { %888 = vmatpush1.bf16.msra.mxu1 %v1503_v54  ;;  %v1583_v54 = vld [vmem:[#allocation5 + $0x1a0] ss:$8 sps:$4 sm:$0xff]  }
  0x69   :  { %970 = vmatpush1.bf16.msra.mxu0 %v1504_v55  ;;  %889 = vmatprep.subr.bf16.mxu1 %v1505_v56  ;;  %v1586_v55 = vld [vmem:[#allocation5 + $0x3a0] ss:$8 sps:$4 sm:$0xff]   ;;  %v1591_v56 = vld [vmem:[#allocation5 + $0x1b4] ss:$8 sps:$4 sm:$0xff]  }
  0x6a   :  { %971 = vmatprep.subr.bf16.mxu0 %v1507_v57  ;;  %v1594_v57 = vld [vmem:[#allocation5 + $0x3b4] ss:$8 sps:$4 sm:$0xff]  }
  0x6c   :  { %890 = vmatpush1.bf16.msra.mxu1 %v1509_v58  ;;  %v1589_v58 = vld [vmem:[#allocation5 + $0x1b0] ss:$8 sps:$4 sm:$0xff]  }
  0x6d   :  { %972 = vmatpush1.bf16.msra.mxu0 %v1510_v59  ;;  %891 = vmatprep.subr.bf16.mxu1 %v1511_v60  ;;  %v1592_v59 = vld [vmem:[#allocation5 + $0x3b0] ss:$8 sps:$4 sm:$0xff]   ;;  %v1597_v60 = vld [vmem:[#allocation5 + $0x1c4] ss:$8 sps:$4 sm:$0xff]  }
  0x6e   :  { %973 = vmatprep.subr.bf16.mxu0 %v1513_v61  ;;  %v1600_v61 = vld [vmem:[#allocation5 + $0x3c4] ss:$8 sps:$4 sm:$0xff]  }
  0x70   :  { %892 = vmatpush1.bf16.msra.mxu1 %v1515_v62  ;;  %v1595_v62 = vld [vmem:[#allocation5 + $0x1c0] ss:$8 sps:$4 sm:$0xff]  }
  0x71   :  { %974 = vmatpush1.bf16.msra.mxu0 %v1516_v63  ;;  %893 = vmatprep.subr.bf16.mxu1 %v1517_v0  ;;  %v1598_v63 = vld [vmem:[#allocation5 + $0x3c0] ss:$8 sps:$4 sm:$0xff]   ;;  %v1603_v0 = vld [vmem:[#allocation5 + $0x1d4] ss:$8 sps:$4 sm:$0xff]  }
  0x72   :  { %975 = vmatprep.subr.bf16.mxu0 %v1519_v1  ;;  %v1606_v1 = vld [vmem:[#allocation5 + $0x3d4] ss:$8 sps:$4 sm:$0xff]  }
  0x74   :  { %894 = vmatpush1.bf16.msra.mxu1 %v1521_v2  ;;  %v1601_v2 = vld [vmem:[#allocation5 + $0x1d0] ss:$8 sps:$4 sm:$0xff]  }
  0x75   :  { %976 = vmatpush1.bf16.msra.mxu0 %v1522_v3  ;;  %904 = vmatprep.subr.bf16.mxu1 %v1525_v4  ;;  %v1604_v3 = vld [vmem:[#allocation5 + $0x3d0] ss:$8 sps:$4 sm:$0xff]   ;;  %v1609_v4 = vld [vmem:[#allocation5 + $0x1e4] ss:$8 sps:$4 sm:$0xff]  }
  0x76   :  { %986 = vmatprep.subr.bf16.mxu0 %v1528_v7  ;;  %v1610_v7 = vld [vmem:[#allocation5 + $0x3e0] ss:$8 sps:$4 sm:$0xff]  }
  0x77   :  { %896 = vmatmul.mubr.bf16.vlgmr.msra.gmra.mrb[0].mxu1 %v75_v10  ;;  %v1613_v10 = vld [vmem:[#allocation5 + $0x1f0] ss:$8 sps:$4 sm:$0xff]  }
  0x78   :  { %978 = vmatmul.mubr.bf16.vlgmr.msra.gmra.mrb[0].mxu0 %v79_v11  ;;  %905 = vmatpush1.bf16.msra.mxu1 %v1523_v8  ;;  %v1615_v8 = vld [vmem:[#allocation5 + $0x1f4] ss:$8 sps:$4 sm:$0xff]   ;;  %v1616_v11 = vld [vmem:[#allocation5 + $0x3f0] ss:$8 sps:$4 sm:$0xff]  }
  0x79   :  { %987 = vmatpush1.bf16.msra.mxu0 %v1526_v9  ;;  %906 = vmatprep.subr.bf16.mxu1 %v1531_v12  ;;  %v1618_v9 = vld [vmem:[#allocation5 + $0x3f4] ss:$8 sps:$4 sm:$0xff]  }
  0x7a   :  { %988 = vmatprep.subr.bf16.mxu0 %v1534_v13  ;;  %936 = vmatprep.mubr.bf16.mxu1 %v78_v37  ;;  %v69_v12 = vld [vmem:[#allocation3 + $0x10] sm:$0xff] }
  0x7b   :  { %1018 = vmatprep.mubr.bf16.mxu0 %v82_v40  ;;  %v73_v13 = vld [vmem:[#allocation3 + $0x30] sm:$0xff] }
  0x7c   :  { %907 = vmatpush1.bf16.msra.mxu1 %v1529_v14  ;;  %v1619_v14 = vld [vmem:[#allocation7 + $0x40] sm:$0xff]  }
  0x7d   :  { %989 = vmatpush1.bf16.msra.mxu0 %v1532_v15  ;;  %908 = vmatprep.subr.bf16.mxu1 %v1537_v16  ;;  %v77_v15 = vpack.c.bf16 %v69_v12, %v69_v12  ;;  %v81_v16 = vpack.c.bf16 %v73_v13, %v73_v13 }
  0x7e   :  { %990 = vmatprep.subr.bf16.mxu0 %v1540_v17  ;;  %v1620_v17 = vld [vmem:[#allocation7] sm:$0xff]  }
  0x80   :  { %909 = vmatpush1.bf16.msra.mxu1 %v1535_v18  ;;  %v1621_v18 = vld [vmem:[#allocation7 + $0x48] sm:$0xff]  }
  0x81   :  { %991 = vmatpush1.bf16.msra.mxu0 %v1538_v19  ;;  %910 = vmatprep.subr.bf16.mxu1 %v1543_v20  ;;  %v1622_v19 = vld [vmem:[#allocation7 + $0x8] sm:$0xff]   ;;  %v1623_v20 = vld [vmem:[#allocation7 + $0x50] sm:$0xff]  }
  0x82   :  { %992 = vmatprep.subr.bf16.mxu0 %v1546_v21  ;;  %v1624_v21 = vld [vmem:[#allocation7 + $0x10] sm:$0xff]  }
  0x84   :  { %911 = vmatpush1.bf16.msra.mxu1 %v1541_v22  ;;  %v1625_v22 = vld [vmem:[#allocation7 + $0x58] sm:$0xff]  }
  0x85   :  { %993 = vmatpush1.bf16.msra.mxu0 %v1544_v23  ;;  %912 = vmatprep.subr.bf16.mxu1 %v1549_v24  ;;  %v1626_v23 = vld [vmem:[#allocation7 + $0x18] sm:$0xff]   ;;  %v1627_v24 = vld [vmem:[#allocation7 + $0x60] sm:$0xff]  }
  0x86   :  { %994 = vmatprep.subr.bf16.mxu0 %v1552_v25  ;;  %v1628_v25 = vld [vmem:[#allocation7 + $0x20] sm:$0xff]  }
  0x88   :  { %913 = vmatpush1.bf16.msra.mxu1 %v1547_v26  ;;  %v1629_v26 = vld [vmem:[#allocation7 + $0x68] sm:$0xff]  }
  0x89   :  { %995 = vmatpush1.bf16.msra.mxu0 %v1550_v27  ;;  %914 = vmatprep.subr.bf16.mxu1 %v1555_v28  ;;  %v1630_v27 = vld [vmem:[#allocation7 + $0x28] sm:$0xff]   ;;  %v1631_v28 = vld [vmem:[#allocation7 + $0x70] sm:$0xff]  }
  0x8a   :  { %996 = vmatprep.subr.bf16.mxu0 %v1558_v29  ;;  %v1632_v29 = vld [vmem:[#allocation7 + $0x30] sm:$0xff]  }
  0x8c   :  { %915 = vmatpush1.bf16.msra.mxu1 %v1553_v30  ;;  %v1633_v30 = vld [vmem:[#allocation7 + $0x78] sm:$0xff]  }
  0x8d   :  { %997 = vmatpush1.bf16.msra.mxu0 %v1556_v31  ;;  %916 = vmatprep.subr.bf16.mxu1 %v1561_v32  ;;  %v1634_v31 = vld [vmem:[#allocation7 + $0x38] sm:$0xff]   ;;  %v213_v32 = vlaneseq }
  0x8e   :  { %998 = vmatprep.subr.bf16.mxu0 %v1564_v33 }
  0x8f   :  { %v214_v33 = vshrl.u32 %v213_v32, 7 }
  0x90   :  { %917 = vmatpush1.bf16.msra.mxu1 %v1559_v35  ;;  %v211_v35 = vld [vmem:[%s1809_s2] sm:$0x3] }
  0x91   :  { %999 = vmatpush1.bf16.msra.mxu0 %v1562_v36  ;;  %918 = vmatprep.subr.bf16.mxu1 %v1567_v39  ;;  %v215_v34 = vsub.s32 0, %v214_v33  ;;  %v219_v36 = vsub.s32 1, %v214_v33 }
  0x92   :  { %1000 = vmatprep.subr.bf16.mxu0 %v1570_v41 }
  0x93   :  { %v216_v37 = vrot.slane %v211_v35, %v215_v34  ;;  %v220_v38 = vrot.slane %v211_v35, %v219_v36 }
  0x94   :  { %919 = vmatpush1.bf16.msra.mxu1 %v1565_v42 }
  0x95   :  { %1001 = vmatpush1.bf16.msra.mxu0 %v1568_v43  ;;  %920 = vmatprep.subr.bf16.mxu1 %v1573_v44 }
  0x96   :  { %1002 = vmatprep.subr.bf16.mxu0 %v1576_v45 }
  0x98   :  { %921 = vmatpush1.bf16.msra.mxu1 %v1571_v46 }
  0x99   :  { %1003 = vmatpush1.bf16.msra.mxu0 %v1574_v47  ;;  %922 = vmatprep.subr.bf16.mxu1 %v1579_v48 }
  0x9a   :  { %1004 = vmatprep.subr.bf16.mxu0 %v1582_v49 }
  0x9c   :  { %923 = vmatpush1.bf16.msra.mxu1 %v1577_v50 }
  0x9d   :  { %1005 = vmatpush1.bf16.msra.mxu0 %v1580_v51  ;;  %924 = vmatprep.subr.bf16.mxu1 %v1585_v52 }
  0x9e   :  { %1006 = vmatprep.subr.bf16.mxu0 %v1588_v53 }
  0xa0   :  { %925 = vmatpush1.bf16.msra.mxu1 %v1583_v54 }
  0xa1   :  { %1007 = vmatpush1.bf16.msra.mxu0 %v1586_v55  ;;  %926 = vmatprep.subr.bf16.mxu1 %v1591_v56 }
  0xa2   :  { %1008 = vmatprep.subr.bf16.mxu0 %v1594_v57 }
  0xa4   :  { %927 = vmatpush1.bf16.msra.mxu1 %v1589_v58  ;;  %v1368_v58 = vld [vmem:[%s1811_s4] ss:$0 sm:$0xff] }
  0xa5   :  { %1009 = vmatpush1.bf16.msra.mxu0 %v1592_v59  ;;  %928 = vmatprep.subr.bf16.mxu1 %v1597_v60 }
  0xa6   :  { %1010 = vmatprep.subr.bf16.mxu0 %v1600_v61 }
  0xa8   :  { %929 = vmatpush1.bf16.msra.mxu1 %v1595_v62 }
  0xa9   :  { %1011 = vmatpush1.bf16.msra.mxu0 %v1598_v63  ;;  %930 = vmatprep.subr.bf16.mxu1 %v1603_v0 }
  0xaa   :  { %1012 = vmatprep.subr.bf16.mxu0 %v1606_v1  ;;  %v1385_v1 = vld [vmem:[%s1812_s5] ss:$0 sm:$0xff] }
  0xac   :  { %931 = vmatpush1.bf16.msra.mxu1 %v1601_v2 }
  0xad   :  { %1013 = vmatpush1.bf16.msra.mxu0 %v1604_v3  ;;  %932 = vmatprep.subr.bf16.mxu1 %v1609_v4  ;;  %v1224_v4 = vstv %s1813_s6 }
  0xae   :  { %1014 = vmatprep.subr.bf16.mxu0 %v1612_v5 }
  0xb0   :  { %933 = vmatpush1.bf16.msra.mxu1 %v1607_v6 }
  0xb1   :  { %1015 = vmatpush1.bf16.msra.mxu0 %v1610_v7  ;;  %934 = vmatprep.subr.bf16.mxu1 %v1615_v8 }
  0xb2   :  { %1016 = vmatprep.subr.bf16.mxu0 %v1618_v9 }
  0xb4   :  { %935 = vmatpush1.bf16.msra.mxu1 %v1613_v10 }
  0xb5   :  { %1017 = vmatpush1.bf16.msra.mxu0 %v1616_v11  ;;  %1386 = vmatprep.subr.bf16.mxu1 %v1619_v14 }
  0xb7   :  { %937 = vmatmul.mubr.bf16.vlgmr.msra.gmra.mrb[0].mxu1 %v77_v15 }
  0xb8   :  { %1019 = vmatmul.mubr.bf16.vlgmr.msra.gmra.mrb[0].mxu0 %v81_v16  ;;  %1387 = vmatpush3.bf16.msra.mxu1 %v1620_v17 }
  0xb9   :  { %1388 = vmatprep.subr.bf16.mxu1 %v1621_v18 }
  0xbc   :  { %1389 = vmatpush3.bf16.msra.mxu1 %v1622_v19 }
  0xbd   :  { %1390 = vmatprep.subr.bf16.mxu1 %v1623_v20 }
  0xc0   :  { %1391 = vmatpush3.bf16.msra.mxu1 %v1624_v21 }
  0xc1   :  { %1392 = vmatprep.subr.bf16.mxu1 %v1625_v22 }
  0xc4   :  { %1393 = vmatpush3.bf16.msra.mxu1 %v1626_v23 }
  0xc5   :  { %1394 = vmatprep.subr.bf16.mxu1 %v1627_v24 }
  0xc8   :  { %1395 = vmatpush3.bf16.msra.mxu1 %v1628_v25 }
  0xc9   :  { %1396 = vmatprep.subr.bf16.mxu1 %v1629_v26 }
  0xcc   :  { %1397 = vmatpush3.bf16.msra.mxu1 %v1630_v27 }
  0xcd   :  { %1398 = vmatprep.subr.bf16.mxu1 %v1631_v28 }
  0xd0   :  { %1399 = vmatpush3.bf16.msra.mxu1 %v1632_v29 }
  0xd1   :  { %1400 = vmatprep.subr.bf16.mxu1 %v1633_v30 }
  0xd4   :  { %1401 = vmatpush3.bf16.msra.mxu1 %v1634_v31 }
 0x18a   :  { %v938_v39 = vpop.f32.mrb[0].mxu1 }
 0x18b   :  { %v1020_v40 = vpop.f32.mrb[0].mxu0  ;;  %v1408_v41 = vadd.f32 %v938_v39, %v216_v37  ;;  %v940_v42 = vpop.f32.mrb[1].mxu1 }
 0x18c   :  { %v1022_v43 = vpop.f32.mrb[1].mxu0  ;;  %v1410_v44 = vadd.f32 %v940_v42, %v220_v38  ;;  %v942_v45 = vpop.f32.mrb[2].mxu1 }
 0x18d   :  { %v1024_v46 = vpop.f32.mrb[2].mxu0  ;;  %v1409_v47 = vadd.f32 %v1408_v41, %v1020_v40  ;;  %v943_v48 = vpop.f32.mrb[3].mxu1 }
 0x18e   :  { %v1025_v49 = vpop.f32.mrb[3].mxu0  ;;  %v1411_v50 = vadd.f32 %v1410_v44, %v1022_v43 }
 0x18f   :  { %vm1027_vm0 = vcmp.gt.f32.partialorder %v1409_v47, 0.0  ;;  %v1029_v51 = vmul.f32 0.01, %v1409_v47 }
 0x190   :  { %vm1028_vm1 = vcmp.gt.f32.partialorder %v1411_v50, 0.0  ;;  %v1030_v52 = vmul.f32 0.01, %v1411_v50 }
 0x191   :  { %v1031_v53 = vsel %vm1027_vm0, %v1409_v47, %v1029_v51 }
 0x192   :  { %v1032_v54 = vsel %vm1028_vm1, %v1411_v50, %v1030_v52  ;;  %v1033_v56 = vpack.c.bf16 %v1031_v53, %v1031_v53 }
 0x193   :  { %v1034_v55 = vpack.c.bf16 %v1032_v54, %v1032_v54 }
 0x195   :  { %1202 = vmatprep.mubr.bf16.mxu1 %v1034_v55 }
 0x196   :  { %1203 = vmatmul.mubr.bf16.vlgmr.msra.gmra.mrb[4].mxu1 %v1033_v56 }
 0x269   :  { %v1402_v57 = vpop.f32.mrb[4].mxu1 }
 0x26a   :  { %v1403_v59 = vpop.f32.mrb[5].mxu1 }
 0x26b   :  { %v1404_v60 = vadd.f32 %v1403_v59, %v1402_v57  ;;  %v1405_v61 = vpop.f32.mrb[6].mxu1 }
 0x26c   :  { %v1406_v62 = vpop.f32.mrb[7].mxu1 }
 0x26d   :  { %v1205_v63 = vadd.f32 %v1404_v60, %v1368_v58 }
 0x26f   :  { %vm1210_vm2 = vcmp.gt.f32.partialorder %v1205_v63, 0.0  ;;  %v1211_v0 = vmul.f32 0.01, %v1205_v63 }
 0x271   :  { %v1212_v2 = vsel %vm1210_vm2, %v1205_v63, %v1211_v0 }
 0x272   :  { %v1220_v3 = vmul.f32 %v1385_v1, %v1212_v2 }
 0x274   :  { %1221 = vadd.xlane.f32.xlu0 %v1220_v3 }
 0x301   :  { %v1222_v5 = vpop.xlane.xlu0 %1221 }
 0x302   :  { %v1225_v6 = vadd.f32 %v1224_v4, %v1222_v5 }
 0x304   :  { %v1226_v7 = vsub.f32 0.0, %v1225_v6 }
 0x306   :  { %v1227_v8 = vmul.f32 1.442695, %v1226_v7 }
 0x308   :  { %1635 = vpow2.f32 %v1227_v8 }
 0x312   :  { %v1636_v9 = vpop.eup %1635 }
 0x313   :  { %v1229_v10 = vadd.f32 1.0, %v1636_v9 }
 0x315   :  { %1637 = vrcp.f32 %v1229_v10 }
 0x31f   :  { %v1638_v11 = vpop.eup %1637 }
 0x320   :  { %1233 = vst.msk [vmem:[%s1814_s7] sm:$0xff] %vm1232_vm3, %v1638_v11 }
 0x321   :  { %1238 = vsyncpa [#allocation4], 1 }
 0x322   :  { %1239 = vsyncpa [#allocation6], 1 }

</bundles_post_ra>
